<compile_context>
chip_gen: v6e
topology: v6e:2x2x1
jax: 0.10.0
libtpu: 0.0.40
codegen_flags: <defaults>
</compile_context>

<pallas_src>
import math
import functools

import jax
import jax.numpy as jnp
from jax import lax
from jax.experimental import pallas as pl
from jax.experimental.pallas import tpu as pltpu


def _round_up(x, m):
    return (x + m - 1) // m * m


def _vmem_capacity_bytes():
    try:
        return int(pltpu.get_tpu_info().vmem_capacity_bytes)
    except Exception:
        return 64 << 20  # conservative default (v7x per-TensorCore VMEM)


def _arcmargin_kernel(x_ref, w_ref, label_ref, out_ref, winv_ref, *wcast_ref,
                      s, cos_m, sin_m, th, mm, easy_margin, tile_c,
                      use_bf16_matmul):
    bi = pl.program_id(1)

    # ---- once per weight tile (B-invariant; hoisted out of the inner loop) --
    # The weight block index only depends on the outer (class) grid axis, so
    # its inverse row norms (already transposed to row layout) and the bf16
    # MXU copy are computed once and cached in VMEM scratch for all B tiles.
    @pl.when(bi == 0)
    def _():
        w = w_ref[...].astype(jnp.float32)                          # (TC, D)
        w_sumsq = jnp.sum(w * w, axis=-1, keepdims=True)            # (TC, 1)
        w_inv = lax.rsqrt(jnp.maximum(w_sumsq, 1e-24))              # (TC, 1)
        winv_ref[...] = w_inv.reshape(1, w_inv.shape[0])            # (1, TC)
        if use_bf16_matmul:
            wcast_ref[0][...] = w.astype(jnp.bfloat16)

    x = x_ref[...].astype(jnp.float32)                              # (TB, D)
    # F.normalize(x, dim=1, eps=1e-12) == x * rsqrt(max(sum(x*x), 1e-24));
    # normalization is applied AFTER the matmul as an outer-product scale.
    x_inv = lax.rsqrt(jnp.maximum(jnp.sum(x * x, axis=-1, keepdims=True), 1e-24))

    if use_bf16_matmul:
        x_mm = x.astype(jnp.bfloat16)
        w_mm = wcast_ref[0][...]
    else:
        x_mm = x
        w_mm = w_ref[...]

    # x @ w.T : contract last dims of both operands (MXU transposed-RHS feed).
    raw = lax.dot_general(
        x_mm, w_mm,
        dimension_numbers=(((1,), (1,)), ((), ())),
        preferred_element_type=jnp.float32)                         # (TB, TC)

    cosine = raw * x_inv * winv_ref[...]                            # (TB, TC)

    # Upper bound of clamp(0, 1) can never trigger for 1 - cos^2 -> maximum().
    sine = jnp.sqrt(jnp.maximum(1.0 - cosine * cosine, 0.0))

    # Fold the final `* s` into the constants (no trailing full-tile multiply).
    cos_s = cosine * s
    phi_s = cos_s * cos_m - sine * (s * sin_m)
    if easy_margin:
        phi_s = jnp.where(cosine > 0.0, phi_s, cos_s)
    else:
        phi_s = jnp.where(cosine > th, phi_s, cos_s - (s * mm))

    # one-hot(label) select: keep the iota (1, TC) and compare against the
    # tile-relative label instead of materializing a (TB, TC) int32 tile.
    labels = label_ref[...]                                         # (TB, 1)
    col0 = pl.program_id(0) * tile_c
    cols = lax.broadcasted_iota(jnp.int32, (1, cosine.shape[1]), 1)
    out_ref[...] = jnp.where(cols == (labels - col0), phi_s, cos_s
                             ).astype(out_ref.dtype)


def arc_margin_product(x, weight, label, *, s=30.0, m=0.5, easy_margin=False,
                       block_b=None, block_c=None, use_bf16_matmul=True):
    """x: (B, in_features), weight: (out_features, in_features),
    label: (B,) int. Returns (B, out_features) float32."""
    B, D = x.shape
    C, D2 = weight.shape
    assert D == D2
    assert label.ndim == 1 and label.shape[0] == B

    vmem_cap = _vmem_capacity_bytes()

    # ---- batch tile: keep the whole (padded) batch VMEM-resident when it is
    # small so x / labels are DMAed exactly once for the entire call.
    Bp8 = _round_up(B, 8)
    if block_b is None:
        block_b = Bp8 if (Bp8 <= 512 and Bp8 * D * 4 <= (4 << 20)) else 128
    tb = _round_up(max(1, min(block_b, Bp8)), 8)
    Bp = _round_up(B, tb)

    # ---- class tile: multiple of 128 (lane-dense output), never > C, and the
    # weight is NEVER padded/copied in HBM (ragged last tile is masked).
    if C < 128:
        tc = C
    else:
        tc_default = 2048 if vmem_cap >= (96 << 20) else 1024   # v5e/v6e vs v7x
        tc = block_c if block_c is not None else tc_default
        tc = max(128, min((tc // 128) * 128, (C // 128) * 128))

    def vmem_est(tc_):
        return (2 * tc_ * D * 4                 # weight block (double-buffered f32)
                + 2 * tb * D * 4                # x block
                + 2 * tb * tc_ * 4              # output block
                + 8 * tc_ * 4                   # w_inv scratch (sublane-padded)
                + (tc_ * D * 2 if use_bf16_matmul else 0)   # bf16 weight cache
                + 6 * tb * tc_ * 4              # live elementwise temporaries
                + (2 << 20))                    # headroom / compiler scratch

    vmem_usable = max(int(vmem_cap * 3 // 4), 16 << 20)   # 48 MiB cap on v7x
    while tc > 128 and vmem_est(tc) > vmem_usable:
        tc = max(128, (tc // 2 // 128) * 128)
    vmem_limit = int(min(max(vmem_est(tc), 16 << 20), vmem_usable))

    # Only the (tiny) batch-side arrays are ever padded.
    xp = x
    lp = label.astype(jnp.int32).reshape(-1, 1)
    if Bp != B:
        xp = jnp.pad(xp, ((0, Bp - B), (0, 0)))
        lp = jnp.pad(lp, ((0, Bp - B), (0, 0)))

    nc = pl.cdiv(C, tc)
    nb = Bp // tb
    grid = (nc, nb)   # class tiles outer (parallel), batch tiles inner (arbitrary)

    kernel = functools.partial(
        _arcmargin_kernel,
        s=float(s),
        cos_m=math.cos(m),
        sin_m=math.sin(m),
        th=math.cos(math.pi - m),
        mm=math.sin(math.pi - m) * m,
        easy_margin=easy_margin,
        tile_c=tc,
        use_bf16_matmul=use_bf16_matmul,
    )

    scratch_shapes = [pltpu.VMEM((1, tc), jnp.float32)]          # cached w_inv
    if use_bf16_matmul:
        scratch_shapes.append(pltpu.VMEM((tc, D), jnp.bfloat16))  # cached bf16 w

    out = pl.pallas_call(
        kernel,
        out_shape=jax.ShapeDtypeStruct((Bp, C), jnp.float32),
        grid=grid,
        in_specs=[
            pl.BlockSpec((tb, D), lambda ci, bi: (bi, 0)),   # x (resident if nb==1)
            pl.BlockSpec((tc, D), lambda ci, bi: (ci, 0)),   # weight (B-invariant)
            pl.BlockSpec((tb, 1), lambda ci, bi: (bi, 0)),   # label
        ],
        out_specs=pl.BlockSpec((tb, tc), lambda ci, bi: (bi, ci)),
        scratch_shapes=scratch_shapes,
        compiler_params=pltpu.CompilerParams(
            dimension_semantics=("parallel", "arbitrary"),
            vmem_limit_bytes=vmem_limit),
    )(xp, weight, lp)

    if Bp != B:
        out = out[:B]
    return out


def _reference(x, w, label, *, s=30.0, m=0.5, easy_margin=False,
               matmul_dtype=jnp.float32):
    """Pure-JAX reference. `matmul_dtype` mirrors the kernel's MXU input dtype
    (norms / accumulation stay f32) so branch decisions match the kernel; with
    float32 it is numerically the PyTorch F.normalize + F.linear formulation."""
    x = x.astype(jnp.float32)
    w = w.astype(jnp.float32)
    x_inv = lax.rsqrt(jnp.maximum(jnp.sum(x * x, axis=1, keepdims=True), 1e-24))
    w_inv = lax.rsqrt(jnp.maximum(jnp.sum(w * w, axis=1, keepdims=True), 1e-24))
    raw = jnp.dot(x.astype(matmul_dtype), w.astype(matmul_dtype).T,
                  preferred_element_type=jnp.float32)
    cosine = raw * x_inv * w_inv.T
    sine = jnp.sqrt(jnp.clip(1.0 - cosine ** 2, 0.0, 1.0))
    cos_m, sin_m = math.cos(m), math.sin(m)
    th, mm = math.cos(math.pi - m), math.sin(math.pi - m) * m
    phi = cosine * cos_m - sine * sin_m
    if easy_margin:
        phi = jnp.where(cosine > 0.0, phi, cosine)
    else:
        phi = jnp.where(cosine > th, phi, cosine - mm)
    one_hot = jax.nn.one_hot(label, cosine.shape[1], dtype=jnp.float32)
    return (one_hot * phi + (1.0 - one_hot) * cosine) * s


if __name__ == "__main__":
    key = jax.random.PRNGKey(0)

    def make_case(k, B, IN, OUT):
        kx, kw, kl = jax.random.split(k, 3)
        xx = jax.random.normal(kx, (B, IN), dtype=jnp.float32)
        bound = math.sqrt(6.0 / (IN + OUT))          # nn.init.xavier_uniform_
        ww = jax.random.uniform(kw, (OUT, IN), minval=-bound, maxval=bound,
                                dtype=jnp.float32)
        ll = jax.random.randint(kl, (B,), 0, OUT, dtype=jnp.int32)
        return xx, ww, ll

    k1, k2, k3 = jax.random.split(key, 3)

    # Case 1: tile-aligned shapes, exact f32 MXU path (tight tolerance).
    x, w, lab = make_case(k1, 8, 32, 128)
    out = jax.block_until_ready(
        arc_margin_product(x, w, lab, s=30.0, m=0.5, easy_margin=False,
                           use_bf16_matmul=False))
    exp = _reference(x, w, lab, s=30.0, m=0.5, easy_margin=False)
    assert out.shape == (8, 128)
    assert jnp.allclose(out, exp, atol=1e-4, rtol=1e-4)

    # Case 2: non-aligned shapes (ragged last class tile, padded batch rows),
    # easy_margin, default bf16 MXU path.
    x2, w2, lab2 = make_case(k2, 5, 48, 200)
    out2 = jax.block_until_ready(
        arc_margin_product(x2, w2, lab2, s=30.0, m=0.5, easy_margin=True))
    exp2 = _reference(x2, w2, lab2, s=30.0, m=0.5, easy_margin=True,
                      matmul_dtype=jnp.bfloat16)
    assert out2.shape == (5, 200)
    assert jnp.allclose(out2, exp2, atol=2e-3, rtol=2e-3)

    # Case 3: multi-tile grid (3 class tiles x 2 batch tiles) exercising the
    # cached per-weight-tile norms / bf16 weight reuse across the inner loop.
    x3, w3, lab3 = make_case(k3, 32, 64, 384)
    out3 = jax.block_until_ready(
        arc_margin_product(x3, w3, lab3, s=30.0, m=0.5, easy_margin=False,
                           block_b=16, block_c=128))
    exp3 = _reference(x3, w3, lab3, s=30.0, m=0.5, easy_margin=False,
                      matmul_dtype=jnp.bfloat16)
    assert out3.shape == (32, 384)
    assert jnp.allclose(out3, exp3, atol=2e-3, rtol=2e-3)

    print("KERNEL_OK")
</pallas_src>

<mosaic_0001>
module attributes {stable_mosaic.version = 11 : i64} {
  func.func @_arcmargin_kernel(%arg0: i32, %arg1: i32, %arg2: memref<8x32xf32, #tpu.memory_space<vmem>>, %arg3: memref<128x32xf32, #tpu.memory_space<vmem>>, %arg4: memref<8x1xi32, #tpu.memory_space<vmem>>, %arg5: memref<8x128xf32, #tpu.memory_space<vmem>>, %arg6: memref<1x128xf32, #tpu.memory_space<vmem>>) attributes {dimension_semantics = [#tpu.dimension_semantics<parallel>, #tpu.dimension_semantics<arbitrary>], iteration_bounds = array<i64: 1, 1>, scalar_prefetch = 0 : i64, scratch_operands = 1 : i64, tpu.core_type = #tpu.core_type<tc>, window_params = [{transform_indices = @transform_0, window_bounds = array<i64: 8, 32>}, {transform_indices = @transform_1, window_bounds = array<i64: 128, 32>}, {transform_indices = @transform_2, window_bounds = array<i64: 8, 1>}, {transform_indices = @transform_3, window_bounds = array<i64: 8, 128>}]} {
    %c0_i32 = arith.constant 0 : i32
    %0 = arith.cmpi eq, %arg1, %c0_i32 : i32
    %1 = arith.extui %0 : i1 to i32
    %c0_i32_0 = arith.constant 0 : i32
    %2 = arith.cmpi ne, %1, %c0_i32_0 : i32
    scf.if %2 {
      %c0_19 = arith.constant 0 : index
      %c0_20 = arith.constant 0 : index
      %45 = vector.load %arg3[%c0_19, %c0_20] : memref<128x32xf32, #tpu.memory_space<vmem>>, vector<128x32xf32>
      %46 = arith.mulf %45, %45 : vector<128x32xf32>
      %cst_21 = arith.constant dense<0.000000e+00> : vector<128xf32>
      %47 = vector.multi_reduction <add>, %46, %cst_21 [1] : vector<128x32xf32> to vector<128xf32>
      %48 = vector.shape_cast %47 : vector<128xf32> to vector<128x1xf32>
      %cst_22 = arith.constant 1.000000e-24 : f32
      %49 = vector.broadcast %cst_22 : f32 to vector<128x1xf32>
      %50 = arith.maximumf %48, %49 : vector<128x1xf32>
      %51 = math.rsqrt %50 : vector<128x1xf32>
      %52 = vector.shape_cast %51 : vector<128x1xf32> to vector<1x128xf32>
      %c0_23 = arith.constant 0 : index
      %c0_24 = arith.constant 0 : index
      %53 = vector.load %arg6[%c0_23, %c0_24] : memref<1x128xf32, #tpu.memory_space<vmem>>, vector<1x128xf32>
      tpu.vector_store %arg6[%c0_23, %c0_24], %52 {strides = array<i32>} : memref<1x128xf32, #tpu.memory_space<vmem>>, vector<1x128xf32>,
    } else {
    }
    %c0 = arith.constant 0 : index
    %c0_1 = arith.constant 0 : index
    %3 = vector.load %arg2[%c0, %c0_1] : memref<8x32xf32, #tpu.memory_space<vmem>>, vector<8x32xf32>
    %4 = arith.mulf %3, %3 : vector<8x32xf32>
    %cst = arith.constant dense<0.000000e+00> : vector<8xf32>
    %5 = vector.multi_reduction <add>, %4, %cst [1] : vector<8x32xf32> to vector<8xf32>
    %6 = vector.shape_cast %5 : vector<8xf32> to vector<8x1xf32>
    %cst_2 = arith.constant 1.000000e-24 : f32
    %7 = vector.broadcast %cst_2 : f32 to vector<8x1xf32>
    %8 = arith.maximumf %6, %7 : vector<8x1xf32>
    %9 = math.rsqrt %8 : vector<8x1xf32>
    %c0_3 = arith.constant 0 : index
    %c0_4 = arith.constant 0 : index
    %10 = vector.load %arg3[%c0_3, %c0_4] : memref<128x32xf32, #tpu.memory_space<vmem>>, vector<128x32xf32>
    %cst_5 = arith.constant dense<0.000000e+00> : vector<8x128xf32>
    %11 = tpu.matmul %3, %10, %cst_5 {dimension_numbers = #tpu.dot_dimension_numbers<[1], [1], [0], [0], [0, 0, 1, 0], [], []>} : vector<8x32xf32>, vector<128x32xf32>, vector<8x128xf32> -> vector<8x128xf32>
    %12 = vector.broadcast %9 : vector<8x1xf32> to vector<8x128xf32>
    %13 = arith.mulf %11, %12 : vector<8x128xf32>
    %c0_6 = arith.constant 0 : index
    %c0_7 = arith.constant 0 : index
    %14 = vector.load %arg6[%c0_6, %c0_7] : memref<1x128xf32, #tpu.memory_space<vmem>>, vector<1x128xf32>
    %15 = vector.broadcast %14 : vector<1x128xf32> to vector<8x128xf32>
    %16 = arith.mulf %13, %15 : vector<8x128xf32>
    %17 = arith.mulf %16, %16 : vector<8x128xf32>
    %cst_8 = arith.constant 1.000000e+00 : f32
    %18 = vector.broadcast %cst_8 : f32 to vector<8x128xf32>
    %19 = arith.subf %18, %17 : vector<8x128xf32>
    %cst_9 = arith.constant 0.000000e+00 : f32
    %20 = vector.broadcast %cst_9 : f32 to vector<8x128xf32>
    %21 = arith.maximumf %19, %20 : vector<8x128xf32>
    %22 = math.sqrt %21 : vector<8x128xf32>
    %cst_10 = arith.constant 3.000000e+01 : f32
    %23 = vector.broadcast %cst_10 : f32 to vector<8x128xf32>
    %24 = arith.mulf %16, %23 : vector<8x128xf32>
    %cst_11 = arith.constant 0.87758255 : f32
    %25 = vector.broadcast %cst_11 : f32 to vector<8x128xf32>
    %26 = arith.mulf %24, %25 : vector<8x128xf32>
    %cst_12 = arith.constant 14.3827658 : f32
    %27 = vector.broadcast %cst_12 : f32 to vector<8x128xf32>
    %28 = arith.mulf %22, %27 : vector<8x128xf32>
    %29 = arith.subf %26, %28 : vector<8x128xf32>
    %cst_13 = arith.constant -0.87758255 : f32
    %30 = vector.broadcast %cst_13 : f32 to vector<8x128xf32>
    %31 = arith.cmpf ogt, %16, %30 : vector<8x128xf32>
    %cst_14 = arith.constant 7.19138288 : f32
    %32 = vector.broadcast %cst_14 : f32 to vector<8x128xf32>
    %33 = arith.subf %24, %32 : vector<8x128xf32>
    %34 = arith.select %31, %29, %33 : vector<8x128xi1>, vector<8x128xf32>
    %c0_15 = arith.constant 0 : index
    %c0_16 = arith.constant 0 : index
    %35 = vector.load %arg4[%c0_15, %c0_16] : memref<8x1xi32, #tpu.memory_space<vmem>>, vector<8x1xi32>
    %c128_i32 = arith.constant 128 : i32
    %36 = arith.muli %arg0, %c128_i32 : i32
    %37 = tpu.iota {dimensions = array<i32: 1>} : vector<1x128xi32>
    %38 = vector.broadcast %36 : i32 to vector<8x1xi32>
    %39 = arith.subi %35, %38 : vector<8x1xi32>
    %40 = vector.broadcast %37 : vector<1x128xi32> to vector<8x128xi32>
    %41 = vector.broadcast %39 : vector<8x1xi32> to vector<8x128xi32>
    %42 = arith.cmpi eq, %40, %41 : vector<8x128xi32>
    %43 = arith.select %42, %34, %24 : vector<8x128xi1>, vector<8x128xf32>
    %c0_17 = arith.constant 0 : index
    %c0_18 = arith.constant 0 : index
    %44 = vector.load %arg5[%c0_17, %c0_18] : memref<8x128xf32, #tpu.memory_space<vmem>>, vector<8x128xf32>
    tpu.vector_store %arg5[%c0_17, %c0_18], %43 {strides = array<i32>} : memref<8x128xf32, #tpu.memory_space<vmem>>, vector<8x128xf32>,
    return
  }
  func.func @transform_0(%arg0: i32, %arg1: i32) -> (i32, i32) {
    %c0_i32 = arith.constant 0 : i32
    %c0_i32_0 = arith.constant 0 : i32
    return %arg1, %c0_i32 : i32, i32
  }
  func.func @transform_1(%arg0: i32, %arg1: i32) -> (i32, i32) {
    %c0_i32 = arith.constant 0 : i32
    %c0_i32_0 = arith.constant 0 : i32
    return %arg0, %c0_i32 : i32, i32
  }
  func.func @transform_2(%arg0: i32, %arg1: i32) -> (i32, i32) {
    %c0_i32 = arith.constant 0 : i32
    %c0_i32_0 = arith.constant 0 : i32
    return %arg1, %c0_i32 : i32, i32
  }
  func.func @transform_3(%arg0: i32, %arg1: i32) -> (i32, i32) {
    %c0_i32 = arith.constant 0 : i32
    return %arg1, %arg0 : i32, i32
  }
}

</mosaic_0001>

<bundles_post_ra>
// kernel: tpu_custom_call.1
= control target key start
LH: loop header
LB: loop body
LE: loop exit
PB: predicated region body
PF: predicated region fallthrough
CT: control target
= control target key end

     0   :  { %vm51_vm0 = vcmask 261120   ;;  %v593_v1 = vmov 0.0   ;;  %vm594_vm1 = vmmov 0   ;;  %v595_v2 = vmov 0   ;;  %s809_s0 = inlined_call_operand.vmem [shape: f32[8,32], index: 0, kind: input, shape index: {}]   ;;  %s810_s1 = inlined_call_operand.vmem [shape: f32[128,32], index: 1, kind: input, shape index: {}]   ;;  %s811_s2 = inlined_call_operand.vmem [shape: s32[8,1], index: 2, kind: input, shape index: {}]   ;;  %s812_s3 = inlined_call_operand.hbm [shape: f32[8,128], index: 3, kind: output, shape index: {}]  }
   0x1   :  { %v620_v0 = vld [vmem:[%s810_s1 + $0x78] sm:$0xff]  ;;  %494 = vmatprep.subr.mxu0 %v593_v1  ;;  %526 = vmatprep.mubr.msk.f32.mxu0 %vm594_vm1, %v593_v1  ;;  %v630_v3 = vld [vmem:[%s810_s1 + $0x70] sm:$0xff]  ;;  %v640_v5 = vld [vmem:[%s810_s1] sm:$0xff] }
   0x2   :  { %495 = vmatpush3.xpose.msk.msra.mxu0 %vm51_vm0, %v620_v0  ;;  %533 = vset.pattern.permute.xlu1 %v595_v2  ;;  %v635_v4 = vld [vmem:[%s810_s1 + $0x18] sm:$0xff]  ;;  %v645_v6 = vld [vmem:[%s810_s1 + $0x10] sm:$0xff]  ;;  %v35_v7 = vmul.f32 %v640_v5, %v640_v5  ;;  %v654_v9 = vld [vmem:[%s810_s1 + $0x8] sm:$0xff] }
   0x3   :  { %496 = vmatprep.subr.mxu0 %v593_v1  ;;  %534 = vset.pattern.permute.xlu0 %v595_v2  ;;  %v37_v8 = vmul.f32 %v645_v6, %v645_v6  ;;  %v38_v10 = vmul.f32 %v635_v4, %v635_v4  ;;  %v36_v11 = vmul.f32 %v654_v9, %v654_v9 }
   0x6   :  { %497 = vmatpush3.xpose.msk.msra.mxu0 %vm51_vm0, %v630_v3 }
   0x7   :  { %8 = vsyncpa [#allocation4], 0  ;;  %498 = vmatprep.subr.mxu0 %v593_v1  ;;  %v282_v12 = vld [vmem:[%s810_s1 + $0x68] sm:$0xff]  ;;  %v52_v13 = vsel %vm51_vm0, %v35_v7, 0.0  ;;  %v58_v14 = vsel %vm51_vm0, %v37_v8, 0.0  ;;  %v676_v16 = vld [vmem:[%s810_s1 + $0x20] sm:$0xff]  ;;  %v49_v46 = vmul.f32 %v630_v3, %v630_v3  ;;  %v50_v47 = vmul.f32 %v620_v0, %v620_v0 }
   0x8   :  { %v671_v15 = vld [vmem:[%s810_s1 + $0x28] sm:$0xff]  ;;  %53 = vadd.xlane.f32.xlu0 %v52_v13  ;;  %59 = vadd.xlane.f32.xlu1 %v58_v14  ;;  %v55_v17 = vsel %vm51_vm0, %v36_v11, 0.0  ;;  %v61_v18 = vsel %vm51_vm0, %v38_v10, 0.0  ;;  %v39_v19 = vmul.f32 %v676_v16, %v676_v16  ;;  %v281_v21 = vld [vmem:[%s810_s1 + $0x60] sm:$0xff]  ;;  %v276_v22 = vld [vmem:[%s810_s1 + $0x38] sm:$0xff]  ;;  %v48_v43 = vmul.f32 %v282_v12, %v282_v12 }
   0x9   :  { %v40_v20 = vmul.f32 %v671_v15, %v671_v15  ;;  %v275_v23 = vld [vmem:[%s810_s1 + $0x30] sm:$0xff]  ;;  %v42_v27 = vmul.f32 %v276_v22, %v276_v22  ;;  %v280_v28 = vld [vmem:[%s810_s1 + $0x58] sm:$0xff]  ;;  %v278_v29 = vld [vmem:[%s810_s1 + $0x48] sm:$0xff]  ;;  %v47_v42 = vmul.f32 %v281_v21, %v281_v21  ;;  %v94_v49 = vsel %vm51_vm0, %v49_v46, 0.0 }
   0xa   :  { %499 = vmatpush3.xpose.msk.msra.mxu0 %vm51_vm0, %v282_v12  ;;  %v64_v24 = vsel %vm51_vm0, %v39_v19, 0.0  ;;  %v41_v26 = vmul.f32 %v275_v23, %v275_v23  ;;  %v277_v30 = vld [vmem:[%s810_s1 + $0x40] sm:$0xff]  ;;  %v44_v34 = vmul.f32 %v278_v29, %v278_v29  ;;  %v279_v35 = vld [vmem:[%s810_s1 + $0x50] sm:$0xff]  ;;  %v46_v39 = vmul.f32 %v280_v28, %v280_v28 }
   0xb   :  { %500 = vmatprep.subr.mxu0 %v593_v1  ;;  %v67_v25 = vsel %vm51_vm0, %v40_v20, 0.0  ;;  %v73_v32 = vsel %vm51_vm0, %v42_v27, 0.0  ;;  %v43_v33 = vmul.f32 %v277_v30, %v277_v30  ;;  %v45_v38 = vmul.f32 %v279_v35, %v279_v35  ;;  %v261_v48 = vld [vmem:[%s809_s0] sm:$0xff] }
   0xc   :  { %56 = vadd.xlane.f32.xlu0 %v55_v17  ;;  %62 = vadd.xlane.f32.xlu1 %v61_v18  ;;  %v70_v31 = vsel %vm51_vm0, %v41_v26, 0.0  ;;  %v79_v37 = vsel %vm51_vm0, %v44_v34, 0.0  ;;  %v85_v41 = vsel %vm51_vm0, %v46_v39, 0.0  ;;  %v88_v44 = vsel %vm51_vm0, %v47_v42, 0.0  ;;  %v432_v53 = vld [vmem:[%s811_s2] sm:$0xff]  ;;  %s596_s2 = smov [#allocation3]  }
   0xd   :  { %v76_v36 = vsel %vm51_vm0, %v43_v33, 0.0  ;;  %v82_v40 = vsel %vm51_vm0, %v45_v38, 0.0  ;;  %v91_v45 = vsel %vm51_vm0, %v48_v43, 0.0  ;;  %v97_v50 = vsel %vm51_vm0, %v50_v47, 0.0  ;;  %s450_s19 = sshll.u32 %s596_s2, 4  ;;  %s451_s19 = int_to_ptr.vmem [resolvable:$true] %s450_s19 }
   0xe   :  { %501 = vmatpush3.xpose.msk.msra.mxu0 %vm51_vm0, %v281_v21  ;;  %v262_v51 = vmul.f32 %v261_v48, %v261_v48  ;;  %v148_v58 = vlaneseq  ;;  %vm159_vm2 = vcmask 130112   ;;  %vm166_vm3 = vcmask 195712   ;;  %s571_s20 = scalar_lea.vmem %s451_s19, 128  ;;  %p576_p1 = scmp.lt.s32.totalorder %s451_s19, %s451_s19 }
   0xf   :  { %502 = vmatprep.subr.mxu0 %v593_v1  ;;  %vm173_vm4 = vcmask 261312   ;;  %vm180_vm5 = vcmask 326912   ;;  %vm187_vm6 = vcmask 392512   ;;  %vm194_vm7 = vcmask 458112   ;;  %p572_p0 = scmp.ne.s32.totalorder %s451_s19, %s571_s20  ;;  %p577_p2 = scmp.lt.s32.totalorder %s571_s20, %s571_s20 }
  0x10   :  { %65 = vadd.xlane.f32.xlu0 %v64_v24  ;;  %68 = vadd.xlane.f32.xlu1 %v67_v25  ;;  %v264_v52 = vsel %vm51_vm0, %v262_v51, 0.0  ;;  %v762_v63 = vand.u32 127, %v148_v58  ;;  %vm201_vm8 = vcmask 523712   ;;  %vm208_vm9 = vcmask 589312  }
  0x11   :  { %vm215_vm10 = vcmask 654912   ;;  %vm222_vm11 = vcmask 720512   ;;  %vm229_vm12 = vcmask 786112   ;;  %vm236_vm13 = vcmask 851712   ;;  %p578_p3 = por %p577_p2, %p576_p1 }
  0x12   :  { %503 = vmatpush3.xpose.msk.msra.mxu0 %vm51_vm0, %v280_v28  ;;  %v154_v8 = vadd.s32 4294967288, %v762_v63  ;;  %v168_v11 = vadd.s32 4294967272, %v762_v63  ;;  %v175_v19 = vadd.s32 4294967264, %v762_v63  ;;  %v189_v27 = vadd.s32 4294967248, %v762_v63 }
  0x13   :  { %504 = vmatprep.subr.mxu0 %v593_v1  ;;  %v203_v42 = vadd.s32 4294967232, %v762_v63  ;;  %vm243_vm14 = vcmask 917312   ;;  %vm250_vm15 = vcmask 982912   ;;  %p579_p4 = pnand %p578_p3, %p572_p0 }
  0x14   :  { %71 = vadd.xlane.f32.xlu0 %v70_v31  ;;  %74 = vadd.xlane.f32.xlu1 %v73_v32 }
  0x16   :  { %505 = vmatpush3.xpose.msk.msra.mxu0 %vm51_vm0, %v279_v35 }
  0x17   :  { %506 = vmatprep.subr.mxu0 %v593_v1 }
  0x18   :  { %77 = vadd.xlane.f32.xlu0 %v76_v36  ;;  %80 = vadd.xlane.f32.xlu1 %v79_v37  ;;  %v196_v37 = vadd.s32 4294967240, %v762_v63 }
  0x1a   :  { %507 = vmatpush3.xpose.msk.msra.mxu0 %vm51_vm0, %v278_v29 }
  0x1b   :  { %508 = vmatprep.subr.mxu0 %v593_v1 }
  0x1c   :  { %83 = vadd.xlane.f32.xlu0 %v82_v40  ;;  %86 = vadd.xlane.f32.xlu1 %v85_v41 }
  0x1e   :  { %509 = vmatpush3.xpose.msk.msra.mxu0 %vm51_vm0, %v277_v30 }
  0x1f   :  { %510 = vmatprep.subr.mxu0 %v593_v1 }
  0x20   :  { %89 = vadd.xlane.f32.xlu0 %v88_v44  ;;  %92 = vadd.xlane.f32.xlu1 %v91_v45 }
  0x22   :  { %511 = vmatpush3.xpose.msk.msra.mxu0 %vm51_vm0, %v276_v22 }
  0x23   :  { %512 = vmatprep.subr.mxu0 %v593_v1 }
  0x24   :  { %95 = vadd.xlane.f32.xlu0 %v94_v49  ;;  %98 = vadd.xlane.f32.xlu1 %v97_v50 }
  0x26   :  { %513 = vmatpush3.xpose.msk.msra.mxu0 %vm51_vm0, %v275_v23  ;;  %v182_v23 = vadd.s32 4294967256, %v762_v63 }
  0x27   :  { %514 = vmatprep.subr.mxu0 %v593_v1 }
  0x28   :  { %265 = vadd.xlane.f32.xlu0 %v264_v52  ;;  %v210_v52 = vadd.s32 4294967224, %v762_v63 }
  0x2a   :  { %515 = vmatpush3.xpose.msk.msra.mxu0 %vm51_vm0, %v671_v15 }
  0x2b   :  { %516 = vmatprep.subr.mxu0 %v593_v1 }
  0x2e   :  { %517 = vmatpush3.xpose.msk.msra.mxu0 %vm51_vm0, %v676_v16 }
  0x2f   :  { %518 = vmatprep.subr.mxu0 %v593_v1 }
  0x32   :  { %519 = vmatpush3.xpose.msk.msra.mxu0 %vm51_vm0, %v635_v4  ;;  %v764_v4 = vshrl.u32 %v148_v58, 7 }
  0x33   :  { %520 = vmatprep.subr.mxu0 %v593_v1 }
  0x34   :  { %v152_v12 = vsub.s32 %v762_v63, %v764_v4  ;;  %v157_v18 = vsub.s32 %v154_v8, %v764_v4  ;;  %v171_v22 = vsub.s32 %v168_v11, %v764_v4  ;;  %v178_v32 = vsub.s32 %v175_v19, %v764_v4 }
  0x35   :  { %439 = vperm.xlu1 %533, %v432_v53   ;;  %v185_v36 = vsub.s32 %v182_v23, %v764_v4  ;;  %v192_v41 = vsub.s32 %v189_v27, %v764_v4  ;;  %v199_v51 = vsub.s32 %v196_v37, %v764_v4  ;;  %v231_v11 = vadd.s32 4294967200, %v762_v63 }
  0x36   :  { %521 = vmatpush3.xpose.msk.msra.mxu0 %vm51_vm0, %v645_v6 }
  0x37   :  { %522 = vmatprep.subr.mxu0 %v593_v1 }
  0x3a   :  { %523 = vmatpush3.xpose.msk.msra.mxu0 %vm51_vm0, %v654_v9 }
  0x3b   :  { %524 = vmatprep.subr.mxu0 %v593_v1 }
  0x3e   :  { %525 = vmatpush3.xpose.msk.msra.mxu0 %vm51_vm0, %v640_v5  ;;  %v161_v5 = vadd.s32 4294967280, %v762_v63 }
  0x40   :  { %v164_v14 = vsub.s32 %v161_v5, %v764_v4 }
  0x41   :  { %527 = vmatmul.mubr.msk.f32.vlgmr.msra.gmra.mxu0 %vm51_vm0, %v261_v48  ;;  %vm257_vm0 = vcmask 1048512  }
  0x91   :  { %v54_v54 = vpop.xlane.xlu0 %53  ;;  %v60_v55 = vpop.xlane.xlu1 %59 }
  0x92   :  { %v100_v56 = vmax.f32 %v54_v54, 1e-24  ;;  %v102_v57 = vmax.f32 %v60_v55, 1e-24 }
  0x94   :  { %535 = vrsqrt.f32 %v100_v56  ;;  %v206_v56 = vsub.s32 %v203_v42, %v764_v4 }
  0x95   :  { %537 = vrsqrt.f32 %v102_v57  ;;  %v57_v59 = vpop.xlane.xlu0 %56  ;;  %v63_v60 = vpop.xlane.xlu1 %62 }
  0x96   :  { %v101_v61 = vmax.f32 %v57_v59, 1e-24  ;;  %v103_v62 = vmax.f32 %v63_v60, 1e-24 }
  0x98   :  { %539 = vrsqrt.f32 %v101_v61  ;;  %v217_v61 = vadd.s32 4294967216, %v762_v63 }
  0x99   :  { %541 = vrsqrt.f32 %v103_v62  ;;  %v66_v0 = vpop.xlane.xlu0 %65  ;;  %v69_v1 = vpop.xlane.xlu1 %68 }
  0x9a   :  { %v104_v2 = vmax.f32 %v66_v0, 1e-24  ;;  %v105_v3 = vmax.f32 %v69_v1, 1e-24 }
  0x9c   :  { %543 = vrsqrt.f32 %v104_v2  ;;  %v213_v2 = vsub.s32 %v210_v52, %v764_v4 }
  0x9d   :  { %545 = vrsqrt.f32 %v105_v3  ;;  %v72_v6 = vpop.xlane.xlu0 %71  ;;  %v75_v7 = vpop.xlane.xlu1 %74  ;;  %v224_v3 = vadd.s32 4294967208, %v762_v63 }
  0x9e   :  { %v106_v9 = vmax.f32 %v72_v6, 1e-24  ;;  %v107_v10 = vmax.f32 %v75_v7, 1e-24 }
  0xa0   :  { %547 = vrsqrt.f32 %v106_v9 }
  0xa1   :  { %v536_v13 = vpop.eup %535  ;;  %549 = vrsqrt.f32 %v107_v10  ;;  %v78_v15 = vpop.xlane.xlu0 %77  ;;  %v220_v10 = vsub.s32 %v217_v61, %v764_v4 }
  0xa2   :  { %v81_v16 = vpop.xlane.xlu1 %80  ;;  %v538_v17 = vpop.eup %537  ;;  %v108_v20 = vmax.f32 %v78_v15, 1e-24  ;;  %v153_v24 = vrot.slane %v536_v13, %v152_v12  ;;  %v227_v13 = vsub.s32 %v224_v3, %v764_v4 }
  0xa3   :  { %v109_v21 = vmax.f32 %v81_v16, 1e-24  ;;  %v165_v26 = vrot.slane %v538_v17, %v164_v14  ;;  %v238_v14 = vadd.s32 4294967192, %v762_v63 }
  0xa4   :  { %551 = vrsqrt.f32 %v108_v20  ;;  %v234_v20 = vsub.s32 %v231_v11, %v764_v4 }
  0xa5   :  { %v540_v25 = vpop.eup %539  ;;  %553 = vrsqrt.f32 %v109_v21  ;;  %v84_v28 = vpop.xlane.xlu0 %83  ;;  %v245_v21 = vadd.s32 4294967184, %v762_v63  ;;  %v241_v23 = vsub.s32 %v238_v14, %v764_v4 }
  0xa6   :  { %v87_v29 = vpop.xlane.xlu1 %86  ;;  %v542_v30 = vpop.eup %541  ;;  %v158_v31 = vrot.slane %v540_v25, %v157_v18  ;;  %v110_v33 = vmax.f32 %v84_v28, 1e-24 }
  0xa7   :  { %v111_v34 = vmax.f32 %v87_v29, 1e-24  ;;  %v172_v35 = vrot.slane %v542_v30, %v171_v22  ;;  %v248_v30 = vsub.s32 %v245_v21, %v764_v4 }
  0xa8   :  { %v160_v38 = vsel %vm159_vm2, %v158_v31, %v153_v24  ;;  %555 = vrsqrt.f32 %v110_v33  ;;  %v252_v24 = vadd.s32 4294967176, %v762_v63 }
  0xa9   :  { %v544_v39 = vpop.eup %543  ;;  %v167_v40 = vsel %vm166_vm3, %v165_v26, %v160_v38  ;;  %557 = vrsqrt.f32 %v111_v34  ;;  %v90_v43 = vpop.xlane.xlu0 %89 }
  0xaa   :  { %v93_v44 = vpop.xlane.xlu1 %92  ;;  %v546_v45 = vpop.eup %545  ;;  %v174_v46 = vsel %vm173_vm4, %v172_v35, %v167_v40  ;;  %v179_v47 = vrot.slane %v544_v39, %v178_v32  ;;  %v112_v48 = vmax.f32 %v90_v43, 1e-24  ;;  %v255_v32 = vsub.s32 %v252_v24, %v764_v4 }
  0xab   :  { %v113_v49 = vmax.f32 %v93_v44, 1e-24  ;;  %v186_v50 = vrot.slane %v546_v45, %v185_v36 }
  0xac   :  { %v181_v53 = vsel %vm180_vm5, %v179_v47, %v174_v46  ;;  %559 = vrsqrt.f32 %v112_v48 }
  0xad   :  { %v548_v54 = vpop.eup %547  ;;  %v188_v55 = vsel %vm187_vm6, %v186_v50, %v181_v53  ;;  %561 = vrsqrt.f32 %v113_v49  ;;  %v96_v57 = vpop.xlane.xlu0 %95 }
  0xae   :  { %v99_v58 = vpop.xlane.xlu1 %98  ;;  %v550_v59 = vpop.eup %549  ;;  %v193_v60 = vrot.slane %v548_v54, %v192_v41  ;;  %v114_v62 = vmax.f32 %v96_v57, 1e-24 }
  0xaf   :  { %v115_v0 = vmax.f32 %v99_v58, 1e-24  ;;  %v200_v1 = vrot.slane %v550_v59, %v199_v51 }
  0xb0   :  { %v195_v5 = vsel %vm194_vm7, %v193_v60, %v188_v55  ;;  %563 = vrsqrt.f32 %v114_v62 }
  0xb1   :  { %v552_v6 = vpop.eup %551  ;;  %v202_v7 = vsel %vm201_vm8, %v200_v1, %v195_v5  ;;  %565 = vrsqrt.f32 %v115_v0  ;;  %v266_v41 = vpop.xlane.xlu0 %265 }
  0xb2   :  { %v554_v8 = vpop.eup %553  ;;  %v207_v9 = vrot.slane %v552_v6, %v206_v56  ;;  %v267_v42 = vmax.f32 %v266_v41, 1e-24  ;;  %v440_v56 = vpop.permute.xlu1 %439 }
  0xb3   :  { %v214_v12 = vrot.slane %v554_v8, %v213_v2  ;;  %vm441_vm3 = vcmp.eq.s32.totalorder %v762_v63, %v440_v56 }
  0xb4   :  { %v209_v15 = vsel %vm208_vm9, %v207_v9, %v202_v7  ;;  %567 = vrsqrt.f32 %v267_v42 }
  0xb5   :  { %v556_v16 = vpop.eup %555  ;;  %v216_v17 = vsel %vm215_vm10, %v214_v12, %v209_v15 }
  0xb6   :  { %v558_v18 = vpop.eup %557  ;;  %v221_v19 = vrot.slane %v556_v16, %v220_v10 }
  0xb7   :  { %v228_v22 = vrot.slane %v558_v18, %v227_v13 }
  0xb8   :  { %v223_v25 = vsel %vm222_vm11, %v221_v19, %v216_v17 }
  0xb9   :  { %v560_v26 = vpop.eup %559  ;;  %v230_v27 = vsel %vm229_vm12, %v228_v22, %v223_v25 }
  0xba   :  { %v562_v28 = vpop.eup %561  ;;  %v235_v29 = vrot.slane %v560_v26, %v234_v20 }
  0xbb   :  { %v242_v31 = vrot.slane %v562_v28, %v241_v23 }
  0xbc   :  { %v237_v33 = vsel %vm236_vm13, %v235_v29, %v230_v27 }
  0xbd   :  { %v564_v34 = vpop.eup %563  ;;  %v244_v35 = vsel %vm243_vm14, %v242_v31, %v237_v33 }
  0xbe   :  { %v566_v36 = vpop.eup %565  ;;  %v249_v37 = vrot.slane %v564_v34, %v248_v30 }
  0xbf   :  { %v256_v38 = vrot.slane %v566_v36, %v255_v32 }
  0xc0   :  { %v251_v39 = vsel %vm250_vm15, %v249_v37, %v244_v35 }
  0xc1   :  { %v258_v40 = vsel %vm257_vm0, %v256_v38, %v251_v39  ;;  %v568_v43 = vpop.eup %567 }
  0xc2   :  { %260 = vst [vmem:[#allocation2] sm:$0x1] %v258_v40 }
  0xc9   :  { %v475_v46 = vld [vmem:[#allocation2] ss:$0 sm:$0xff] }
 0x101   :  { %v402_v44 = vpop.f32.mrf.mxu0 }
 0x102   :  { %v406_v45 = vmul.f32 %v568_v43, %v402_v44 }
 0x103   :  { %v528_v47 = vpop.f32.mrf.mxu0 }
 0x104   :  { %v414_v4 = vmul.f32 %v475_v46, %v406_v45 }
 0x106   :  { %v415_v48 = vmul.f32 %v414_v4, %v414_v4  ;;  %v425_v53 = vmul.f32 30.0, %v414_v4  ;;  %vm429_vm4 = vcmp.gt.f32.partialorder %v414_v4, -0.87758255 }
 0x108   :  { %v416_v49 = vsub.f32 1.0, %v415_v48  ;;  %v426_v58 = vmul.f32 0.87758255, %v425_v53  ;;  %v476_v61 = vadd.f32 -7.191383, %v425_v53 }
 0x10a   :  { %v417_v50 = vmax.f32 %v416_v49, 0.0 }
 0x10c   :  { %569 = vrsqrt.f32 %v417_v50  ;;  %vm420_vm1 = vcmp.eq.f32.partialorder %v417_v50, inf  ;;  %v423_v54 = vand.u32 2147483648, %v417_v50  ;;  %vm422_vm2 = vcmp.eq.f32.partialorder %v417_v50, 0.0 }
 0x119   :  { %v570_v51 = vpop.eup %569 }
 0x11a   :  { %v419_v52 = vmul.f32 %v570_v51, %v417_v50 }
 0x11c   :  { %v421_v55 = vsel %vm420_vm1, %v417_v50, %v419_v52 }
 0x11d   :  { %v424_v57 = vsel %vm422_vm2, %v423_v54, %v421_v55 }
 0x11e   :  { %v427_v59 = vmul.f32 14.382766, %v424_v57 }
 0x120   :  { %v428_v60 = vsub.f32 %v426_v58, %v427_v59 }
 0x122   :  { %v431_v62 = vsel %vm429_vm4, %v428_v60, %v476_v61 }
 0x123   :  { %v442_v0 = vsel %vm441_vm3, %v431_v62, %v425_v53 }
 0x124   :  { %443 = vst [vmem:[#allocation3] sm:$0xff] %v442_v0 }
 0x125   :  { %582 = shalt.err (!%p579_p4)
}
 0x126   :  { %453 = dma.vmem_to_hbm [thread:$0]  %s451_s19, 128, %s812_s3, [#allocation4]  }
 0x127   :  { %591 = dma.done.wait [#allocation4], 128  }
 0x128   :  { %592 = vsyncadd [#allocation4], 4294967168 }
 0x129   :  { %457 = vsyncpa [#allocation4], 1 }

</bundles_post_ra>
